<compile_context>
chip_gen: v6e
topology: v6e:2x2x1
jax: 0.10.0
libtpu: 0.0.40
codegen_flags: <defaults>
</compile_context>

<pallas_src>
import jax
import jax.numpy as jnp
from jax.experimental import pallas as pl
from jax.experimental.pallas import tpu as pltpu


def make_aug_kernel(n_view, R, H, W, wy, wx):
    """R = rows per block (= NB*C).  wy/wx: static 3-tap blur weights (floats)."""
    HW = H * W

    def wmul(t, wgt):
        return t if wgt == 1.0 else wgt * t

    def tap3(minus, center, plus, w):
        # w = (weight at -1, weight at 0, weight at +1)
        return wmul(minus, w[0]) + wmul(center, w[1]) + wmul(plus, w[2])

    def kernel(a_ref, shift_ref, mask_ref, x_ref, o_ref):
        # a_ref     : VMEM (n_view, R, 1)  per-view/row scale = s_v * norm / std_c
        # shift_ref : VMEM (R, 1)          -mean_c / std_c
        # mask_ref  : VMEM (4, HW) f32     validity of {left,right,up,down} taps
        # x_ref     : VMEM (R, HW)         NB images, channel rows, flattened plane
        # o_ref     : VMEM (n_view, R, HW)
        x = x_ref[...].astype(jnp.float32)
        m = mask_ref[...]

        # Separable 3x3 blur.  Neighbor access = lane rotation (XLU); the
        # precomputed masks zero the lanes that wrapped across an image row /
        # image boundary, which reproduces 'SAME' zero padding exactly.
        left = pltpu.roll(x, 1, 1) * m[0:1, :]        # x[j-1]
        right = pltpu.roll(x, HW - 1, 1) * m[1:2, :]  # x[j+1]
        h = tap3(left, x, right, wx)

        up = pltpu.roll(h, W, 1) * m[2:3, :]          # h[j-W]
        down = pltpu.roll(h, HW - W, 1) * m[3:4, :]   # h[j+W]
        b = tap3(up, h, down, wy)

        # Hoist the shift broadcast out of the per-view loop (no CSE of
        # broadcast_in_dim in JAX).
        shift_b = jnp.broadcast_to(shift_ref[...], (R, HW))

        # Per-view affine: (blur(s*x) - mean)/std == blur_raw(x)*(s*norm/std) - mean/std.
        # TODO(synk): on v6e/v7x with bf16 outputs this affine could run in bf16.
        for v in range(n_view):                        # static, n_view small
            o_ref[v] = (b * a_ref[v] + shift_b).astype(o_ref.dtype)

    return kernel


def _round_up(v, m):
    return -(-v // m) * m


def _sublane_multiple(itemsize):
    # native sublane tiling: f32 -> 8, bf16 -> 16, int8/fp8 -> 32
    return max(8, 32 // max(int(itemsize), 1))


def _pick_batch_block(N, C, HW, n_view, in_itemsize, out_itemsize,
                      budget_bytes=20 << 20, prefer_multiple_blocks=True):
    """Largest batch block NB whose *padded* double-buffered in/out tiles fit
    the VMEM budget, subject to the BlockSpec (8,128) rule on NB*C rows.

    The 20 MiB block budget leaves headroom under the 32 MiB vmem_limit we
    request (safe on v5e/v6e, and within v7x's per-core 64 MiB)."""
    pcol = _round_up(HW, 128)

    def padded_bytes(nb):
        rows = nb * C
        in_b = 2 * _round_up(rows, _sublane_multiple(in_itemsize)) * pcol * in_itemsize
        out_b = 2 * n_view * _round_up(rows, _sublane_multiple(out_itemsize)) * pcol * out_itemsize
        const_b = 2 * (n_view + 2) * _round_up(rows, 8) * 128 * 4   # a, shift, masks
        return in_b + out_b + const_b

    candidates = [nb for nb in range(1, N + 1)
                  if N % nb == 0 and ((nb * C) % 8 == 0 or nb == N)]
    fitting = [nb for nb in candidates if padded_bytes(nb) <= budget_bytes]
    if not fitting:
        return int(min(candidates))     # smallest legal block; best effort
    best = max(fitting)
    if prefer_multiple_blocks and best == N and N > 1:
        smaller = [nb for nb in fitting if nb < N]
        if smaller:
            best = max(smaller)         # keep >=2 grid steps so megacore (v7x) can shard
    return int(best)


def augmentation_forward(x, scales, blur_taps, mean, std, *, block_n=None):
    """Pallas implementation of the transform chain applied n_view = len(scales) times."""
    N, C, H, W = x.shape
    HW = H * W
    n_view = int(scales.shape[0])
    wy, wx, norm = blur_taps

    # Fold per-view brightness AND the blur normalization into the per-channel
    # normalize scale (the blur is linear):
    #   (blur(s*x) - mean)/std == blur_raw(x) * (s*norm/std) + (-mean/std)
    inv_std = 1.0 / std.astype(jnp.float32)
    a = scales.astype(jnp.float32)[:, None] * (norm * inv_std)[None, :]      # (n_view, C)
    shift = -mean.astype(jnp.float32) * inv_std                              # (C,)

    itemsize = jnp.dtype(x.dtype).itemsize
    if block_n is None:
        block_n = _pick_batch_block(N, C, HW, n_view, itemsize, itemsize)
    NB = int(block_n)
    assert N % NB == 0 and ((NB * C) % 8 == 0 or NB == N), "invalid batch block"
    R = NB * C

    # Per-row constants (image-major, channel-minor); identical for every block.
    a_rows = jnp.tile(a, (1, NB)).reshape(n_view, R, 1)
    shift_rows = jnp.tile(shift, (NB,)).reshape(R, 1)

    # Boundary-validity masks for the 4 shifted taps in the flattened lane dim.
    idx = jnp.arange(HW, dtype=jnp.int32)
    wpos, hpos = idx % W, idx // W
    masks = jnp.stack([wpos > 0, wpos < W - 1, hpos > 0, hpos < H - 1],
                      axis=0).astype(jnp.float32)                            # (4, HW)

    # Lane-dense layout: spatial plane (H*W) on lanes, batch*channel on sublanes.
    x2 = x.reshape(N * C, HW)

    kernel = make_aug_kernel(n_view, R, H, W, wy, wx)

    out = pl.pallas_call(
        kernel,
        out_shape=jax.ShapeDtypeStruct((n_view, N * C, HW), x.dtype),
        grid=(N // NB,),
        in_specs=[
            # tiny constants: constant block index -> stay resident in VMEM
            pl.BlockSpec((n_view, R, 1), lambda n: (0, 0, 0)),
            pl.BlockSpec((R, 1), lambda n: (0, 0)),
            pl.BlockSpec((4, HW), lambda n: (0, 0)),
            # NB images per step; each image read from HBM exactly once
            pl.BlockSpec((R, HW), lambda n: (n, 0)),
        ],
        out_specs=pl.BlockSpec((n_view, R, HW), lambda n: (0, n, 0)),
        compiler_params=pltpu.CompilerParams(
            dimension_semantics=("parallel",),
            vmem_limit_bytes=32 << 20),
    )(a_rows, shift_rows, masks, x2)

    out = out.reshape(n_view, N, C, H, W)

    # Original wrapper semantics: n_view == 1 -> single tensor, else list of views.
    if n_view == 1:
        return out[0]
    return [out[i] for i in range(n_view)]


def reference_forward(x, scales, blur_arr, mean, std):
    """Pure-JAX reference mirroring the PyTorch chain semantics (exact f32,
    no MXU conv, so the tolerance check is meaningful)."""
    N, C, H, W = x.shape
    xpad = jnp.pad(x, ((0, 0), (0, 0), (1, 1), (1, 1)))
    outs = []
    for i in range(scales.shape[0]):
        xp = xpad * scales[i]
        y = jnp.zeros_like(x)
        for dy in range(3):
            for dx in range(3):
                y = y + blur_arr[dy, dx] * xp[:, :, dy:dy + H, dx:dx + W]
        y = (y - mean.reshape(1, C, 1, 1)) / std.reshape(1, C, 1, 1)
        outs.append(y)
    return outs


if __name__ == "__main__":
    key = jax.random.PRNGKey(0)
    N, C, H, W = 2, 4, 16, 16
    n_view = 2

    x = jax.random.normal(key, (N, C, H, W), dtype=jnp.float32)

    # Deterministic "parameters" of the transform chain.
    # TODO(synk): arbitrary user-supplied Python callables in _CallableChain have
    # no generic Pallas equivalent; a concrete brightness->blur->normalize chain
    # is instantiated here instead.
    wy = [1.0, 2.0, 1.0]
    wx = [1.0, 2.0, 1.0]
    norm = 1.0 / 16.0
    blur_arr = (jnp.array(wy, jnp.float32)[:, None]
                * jnp.array(wx, jnp.float32)[None, :] * norm)
    mean = 0.1 * (jnp.arange(C, dtype=jnp.float32) + 1.0)
    std = 0.5 + 0.1 * jnp.arange(C, dtype=jnp.float32)
    scales = 0.9 + 0.2 * jnp.arange(n_view, dtype=jnp.float32)   # [0.9, 1.1]

    views = augmentation_forward(x, scales, (wy, wx, norm), mean, std)
    views = [jax.block_until_ready(v) for v in views]

    refs = reference_forward(x, scales, blur_arr, mean, std)
    for got, ref in zip(views, refs):
        assert got.shape == (N, C, H, W)
        assert jnp.allclose(got, ref, atol=1e-5, rtol=1e-5), "mismatch vs reference"

    print("KERNEL_OK")
</pallas_src>

<mosaic_0001>
module attributes {stable_mosaic.version = 11 : i64} {
  func.func @kernel(%arg0: i32, %arg1: memref<2x8x1xf32, #tpu.memory_space<vmem>>, %arg2: memref<8x1xf32, #tpu.memory_space<vmem>>, %arg3: memref<4x256xf32, #tpu.memory_space<vmem>>, %arg4: memref<8x256xf32, #tpu.memory_space<vmem>>, %arg5: memref<2x8x256xf32, #tpu.memory_space<vmem>>) attributes {dimension_semantics = [#tpu.dimension_semantics<parallel>], iteration_bounds = array<i64: 1>, scalar_prefetch = 0 : i64, scratch_operands = 0 : i64, tpu.core_type = #tpu.core_type<tc>, window_params = [{pipeline_mode = #tpu.pipeline_mode<synchronous>, transform_indices = @transform_0, window_bounds = array<i64: 2, 8, 1>}, {pipeline_mode = #tpu.pipeline_mode<synchronous>, transform_indices = @transform_1, window_bounds = array<i64: 8, 1>}, {pipeline_mode = #tpu.pipeline_mode<synchronous>, transform_indices = @transform_2, window_bounds = array<i64: 4, 256>}, {transform_indices = @transform_3, window_bounds = array<i64: 8, 256>}, {transform_indices = @transform_4, window_bounds = array<i64: 2, 8, 256>}]} {
    %c0 = arith.constant 0 : index
    %c0_0 = arith.constant 0 : index
    %0 = vector.load %arg4[%c0, %c0_0] : memref<8x256xf32, #tpu.memory_space<vmem>>, vector<8x256xf32>
    %c0_1 = arith.constant 0 : index
    %c0_2 = arith.constant 0 : index
    %1 = vector.load %arg3[%c0_1, %c0_2] : memref<4x256xf32, #tpu.memory_space<vmem>>, vector<4x256xf32>
    %c1_i32 = arith.constant 1 : i32
    %2 = tpu.dynamic_rotate %0 by %c1_i32 dim 1 : vector<8x256xf32>, i32 -> vector<8x256xf32>
    %3 = vector.extract_strided_slice %1 {offsets = [0, 0], sizes = [1, 256], strides = [1, 1]} : vector<4x256xf32> to vector<1x256xf32>
    %4 = vector.broadcast %3 : vector<1x256xf32> to vector<8x256xf32>
    %5 = arith.mulf %2, %4 : vector<8x256xf32>
    %c255_i32 = arith.constant 255 : i32
    %6 = tpu.dynamic_rotate %0 by %c255_i32 dim 1 : vector<8x256xf32>, i32 -> vector<8x256xf32>
    %7 = vector.extract_strided_slice %1 {offsets = [1, 0], sizes = [1, 256], strides = [1, 1]} : vector<4x256xf32> to vector<1x256xf32>
    %8 = vector.broadcast %7 : vector<1x256xf32> to vector<8x256xf32>
    %9 = arith.mulf %6, %8 : vector<8x256xf32>
    %cst = arith.constant 2.000000e+00 : f32
    %10 = vector.broadcast %cst : f32 to vector<8x256xf32>
    %11 = arith.mulf %10, %0 : vector<8x256xf32>
    %12 = arith.addf %5, %11 : vector<8x256xf32>
    %13 = arith.addf %12, %9 : vector<8x256xf32>
    %c16_i32 = arith.constant 16 : i32
    %14 = tpu.dynamic_rotate %13 by %c16_i32 dim 1 : vector<8x256xf32>, i32 -> vector<8x256xf32>
    %15 = vector.extract_strided_slice %1 {offsets = [2, 0], sizes = [1, 256], strides = [1, 1]} : vector<4x256xf32> to vector<1x256xf32>
    %16 = vector.broadcast %15 : vector<1x256xf32> to vector<8x256xf32>
    %17 = arith.mulf %14, %16 : vector<8x256xf32>
    %c240_i32 = arith.constant 240 : i32
    %18 = tpu.dynamic_rotate %13 by %c240_i32 dim 1 : vector<8x256xf32>, i32 -> vector<8x256xf32>
    %19 = vector.extract_strided_slice %1 {offsets = [3, 0], sizes = [1, 256], strides = [1, 1]} : vector<4x256xf32> to vector<1x256xf32>
    %20 = vector.broadcast %19 : vector<1x256xf32> to vector<8x256xf32>
    %21 = arith.mulf %18, %20 : vector<8x256xf32>
    %cst_3 = arith.constant 2.000000e+00 : f32
    %22 = vector.broadcast %cst_3 : f32 to vector<8x256xf32>
    %23 = arith.mulf %22, %13 : vector<8x256xf32>
    %24 = arith.addf %17, %23 : vector<8x256xf32>
    %25 = arith.addf %24, %21 : vector<8x256xf32>
    %c0_4 = arith.constant 0 : index
    %c0_5 = arith.constant 0 : index
    %26 = vector.load %arg2[%c0_4, %c0_5] : memref<8x1xf32, #tpu.memory_space<vmem>>, vector<8x1xf32>
    %27 = vector.shape_cast %26 : vector<8x1xf32> to vector<8x1xf32>
    %28 = vector.broadcast %27 : vector<8x1xf32> to vector<8x256xf32>
    %c0_6 = arith.constant 0 : index
    %c0_7 = arith.constant 0 : index
    %c0_8 = arith.constant 0 : index
    %29 = vector.load %arg1[%c0_6, %c0_7, %c0_8] : memref<2x8x1xf32, #tpu.memory_space<vmem>>, vector<1x8x1xf32>
    %30 = vector.shape_cast %29 : vector<1x8x1xf32> to vector<8x1xf32>
    %31 = vector.broadcast %30 : vector<8x1xf32> to vector<8x256xf32>
    %32 = arith.mulf %25, %31 : vector<8x256xf32>
    %33 = arith.addf %32, %28 : vector<8x256xf32>
    %c0_9 = arith.constant 0 : index
    %c0_10 = arith.constant 0 : index
    %c0_11 = arith.constant 0 : index
    %34 = vector.load %arg5[%c0_9, %c0_10, %c0_11] : memref<2x8x256xf32, #tpu.memory_space<vmem>>, vector<1x8x256xf32>
    %35 = vector.shape_cast %34 : vector<1x8x256xf32> to vector<8x256xf32>
    %36 = vector.shape_cast %33 : vector<8x256xf32> to vector<1x8x256xf32>
    tpu.vector_store %arg5[%c0_9, %c0_10, %c0_11], %36 {strides = array<i32>} : memref<2x8x256xf32, #tpu.memory_space<vmem>>, vector<1x8x256xf32>,
    %c1 = arith.constant 1 : index
    %c0_12 = arith.constant 0 : index
    %c0_13 = arith.constant 0 : index
    %37 = vector.load %arg1[%c1, %c0_12, %c0_13] : memref<2x8x1xf32, #tpu.memory_space<vmem>>, vector<1x8x1xf32>
    %38 = vector.shape_cast %37 : vector<1x8x1xf32> to vector<8x1xf32>
    %39 = vector.broadcast %38 : vector<8x1xf32> to vector<8x256xf32>
    %40 = arith.mulf %25, %39 : vector<8x256xf32>
    %41 = arith.addf %40, %28 : vector<8x256xf32>
    %c1_14 = arith.constant 1 : index
    %c0_15 = arith.constant 0 : index
    %c0_16 = arith.constant 0 : index
    %42 = vector.load %arg5[%c1_14, %c0_15, %c0_16] : memref<2x8x256xf32, #tpu.memory_space<vmem>>, vector<1x8x256xf32>
    %43 = vector.shape_cast %42 : vector<1x8x256xf32> to vector<8x256xf32>
    %44 = vector.shape_cast %41 : vector<8x256xf32> to vector<1x8x256xf32>
    tpu.vector_store %arg5[%c1_14, %c0_15, %c0_16], %44 {strides = array<i32>} : memref<2x8x256xf32, #tpu.memory_space<vmem>>, vector<1x8x256xf32>,
    return
  }
  func.func @transform_0(%arg0: i32) -> (i32, i32, i32) {
    %c0_i32 = arith.constant 0 : i32
    %c0_i32_0 = arith.constant 0 : i32
    %c0_i32_1 = arith.constant 0 : i32
    %c0_i32_2 = arith.constant 0 : i32
    return %c0_i32, %c0_i32_0, %c0_i32_1 : i32, i32, i32
  }
  func.func @transform_1(%arg0: i32) -> (i32, i32) {
    %c0_i32 = arith.constant 0 : i32
    %c0_i32_0 = arith.constant 0 : i32
    %c0_i32_1 = arith.constant 0 : i32
    return %c0_i32, %c0_i32_0 : i32, i32
  }
  func.func @transform_2(%arg0: i32) -> (i32, i32) {
    %c0_i32 = arith.constant 0 : i32
    %c0_i32_0 = arith.constant 0 : i32
    %c0_i32_1 = arith.constant 0 : i32
    return %c0_i32, %c0_i32_0 : i32, i32
  }
  func.func @transform_3(%arg0: i32) -> (i32, i32) {
    %c0_i32 = arith.constant 0 : i32
    %c0_i32_0 = arith.constant 0 : i32
    return %arg0, %c0_i32 : i32, i32
  }
  func.func @transform_4(%arg0: i32) -> (i32, i32, i32) {
    %c0_i32 = arith.constant 0 : i32
    %c0_i32_0 = arith.constant 0 : i32
    %c0_i32_1 = arith.constant 0 : i32
    return %c0_i32, %arg0, %c0_i32_0 : i32, i32, i32
  }
}

</mosaic_0001>

<bundles_post_ra>
// kernel: tpu_custom_call.1
= control target key start
LH: loop header
LB: loop body
LE: loop exit
PB: predicated region body
PF: predicated region fallthrough
CT: control target
= control target key end

     0   :  { %s224_s17 = smov 127   ;;  %s225_s18 = smov 1   ;;  %s296_s0 = inlined_call_operand.vmem [shape: f32[2,8,1], index: 0, kind: input, shape index: {}]   ;;  %s297_s1 = inlined_call_operand.vmem [shape: f32[8,1], index: 1, kind: input, shape index: {}]   ;;  %s298_s2 = inlined_call_operand.vmem [shape: f32[4,256], index: 2, kind: input, shape index: {}]   ;;  %s299_s3 = inlined_call_operand.vmem [shape: f32[8,256], index: 3, kind: input, shape index: {}]   ;;  %s300_s4 = inlined_call_operand.hbm [shape: f32[2,8,256], index: 4, kind: output, shape index: {}]  }
   0x1   :  { %v18_v0 = vld [vmem:[%s299_s3] sm:$0xff] }
   0x2   :  { %51 = vrot.lane.b32.xlu1 %v18_v0, %s224_s17  ;;  %21 = vrot.lane.b32.xlu0 %v18_v0, %s225_s18 }
   0x3   :  { %9 = vsyncpa [#allocation3], 0  ;;  %v19_v1 = vld [vmem:[%s299_s3 + $0x8] sm:$0xff]  ;;  %v226_v2 = vmov 0   ;;  %v25_v3 = vlaneseq  ;;  %v265_v7 = vld [vmem:[%s298_s2] sm:$0xff]  ;;  %v78_v19 = vmul.f32 2.0, %v18_v0 }
   0x4   :  { %201 = vset.pattern.permute.xlu1 %v226_v2  ;;  %200 = vset.pattern.permute.xlu0 %v226_v2  ;;  %v79_v20 = vmul.f32 2.0, %v19_v1  ;;  %s227_s2 = smov 16   ;;  %v192_v37 = vld [vmem:[%s296_s0 + $0x8] sm:$0xff]  ;;  %s228_s24 = smov 112   ;;  %v150_v38 = vld [vmem:[%s296_s0] sm:$0xff] }
   0x5   :  { %v32_v4 = vshrl.u32 %v25_v3, 7  ;;  %v267_v10 = vand.u32 127, %v25_v3  ;;  %v144_v39 = vld [vmem:[%s297_s1] sm:$0xff]  ;;  %s229_s0 = smov [#allocation2]  }
   0x6   :  { %53 = vrot.lane.b32.xlu1 %v19_v1, %s224_s17  ;;  %23 = vrot.lane.b32.xlu0 %v19_v1, %s225_s18  ;;  %s181_s1 = sshll.u32 %s229_s0, 4  ;;  %s182_s1 = int_to_ptr.vmem [resolvable:$true] %s181_s1 }
   0x7   :  { %v33_v5 = vsub.s32 0, %v32_v4  ;;  %v37_v6 = vsub.s32 4, %v32_v4  ;;  %v60_v8 = vsub.s32 1, %v32_v4  ;;  %v64_v9 = vsub.s32 5, %v32_v4  ;;  %s202_s29 = scalar_lea.vmem %s182_s1, 512  ;;  %p207_p1 = scmp.lt.s32.totalorder %s182_s1, %s182_s1 }
   0x8   :  { %vm55_vm0 = vcmp.lt.s32.totalorder %v267_v10, 127  ;;  %vm27_vm1 = vcmp.lt.s32.totalorder %v267_v10, 1  ;;  %v93_v40 = vsub.s32 2, %v32_v4  ;;  %v97_v41 = vsub.s32 6, %v32_v4  ;;  %p203_p0 = scmp.ne.s32.totalorder %s182_s1, %s202_s29  ;;  %p208_p2 = scmp.lt.s32.totalorder %s202_s29, %s202_s29 }
   0x9   :  { %v34_v11 = vrot.slane %v265_v7, %v33_v5  ;;  %v38_v12 = vrot.slane %v265_v7, %v37_v6  ;;  %v61_v15 = vrot.slane %v265_v7, %v60_v8  ;;  %v65_v16 = vrot.slane %v265_v7, %v64_v9 }
   0xa   :  { %v94_v42 = vrot.slane %v265_v7, %v93_v40  ;;  %v98_v43 = vrot.slane %v265_v7, %v97_v41  ;;  %v120_v44 = vsub.s32 3, %v32_v4  ;;  %v124_v45 = vsub.s32 7, %v32_v4  ;;  %p209_p3 = por %p208_p2, %p207_p1 }
   0xb   :  { %v44_v17 = vrot.slane %v34_v11, %v33_v5  ;;  %v48_v18 = vrot.slane %v38_v12, %v33_v5  ;;  %v71_v21 = vrot.slane %v61_v15, %v60_v8  ;;  %v75_v22 = vrot.slane %v65_v16, %v60_v8 }
   0xc   :  { %vm88_vm2 = vcmp.lt.s32.totalorder %v267_v10, 16  ;;  %v104_v48 = vrot.slane %v94_v42, %v93_v40  ;;  %v108_v49 = vrot.slane %v98_v43, %v93_v40  ;;  %v121_v50 = vrot.slane %v265_v7, %v120_v44  ;;  %p210_p4 = pnand %p209_p3, %p203_p0 }
   0xd   :  { %v125_v51 = vrot.slane %v265_v7, %v124_v45  ;;  %vm115_vm3 = vcmp.lt.s32.totalorder %v267_v10, 112 }
   0xe   :  { %v131_v57 = vrot.slane %v121_v50, %v120_v44 }
   0xf   :  { %v135_v58 = vrot.slane %v125_v51, %v120_v44 }
  0x74   :  { %v52_v13 = vpop.permute.xlu1 %51  ;;  %v22_v14 = vpop.permute.xlu0 %21 }
  0x78   :  { %v54_v23 = vpop.permute.xlu1 %53  ;;  %v24_v24 = vpop.permute.xlu0 %23 }
  0x79   :  { %v56_v25 = vsel %vm55_vm0, %v52_v13, %v54_v23  ;;  %v57_v26 = vsel %vm55_vm0, %v54_v23, %v52_v13  ;;  %v28_v27 = vsel %vm27_vm1, %v22_v14, %v24_v24  ;;  %v29_v28 = vsel %vm27_vm1, %v24_v24, %v22_v14 }
  0x7a   :  { %v49_v29 = vmul.f32 %v44_v17, %v29_v28  ;;  %v50_v30 = vmul.f32 %v48_v18, %v28_v27  ;;  %v76_v31 = vmul.f32 %v71_v21, %v56_v25  ;;  %v77_v32 = vmul.f32 %v75_v22, %v57_v26 }
  0x7c   :  { %v80_v33 = vadd.f32 %v78_v19, %v49_v29  ;;  %v81_v34 = vadd.f32 %v79_v20, %v50_v30 }
  0x7e   :  { %v83_v35 = vadd.f32 %v81_v34, %v77_v32  ;;  %v82_v36 = vadd.f32 %v80_v33, %v76_v31 }
  0x80   :  { %86 = vrot.lane.b32.xlu1 %v83_v35, %s227_s2  ;;  %84 = vrot.lane.b32.xlu0 %v82_v36, %s227_s2  ;;  %v139_v61 = vmul.f32 2.0, %v83_v35  ;;  %v138_v62 = vmul.f32 2.0, %v82_v36 }
  0x84   :  { %166 = vperm.xlu1 %201, %v192_v37   ;;  %111 = vrot.lane.b32.xlu0 %v82_v36, %s228_s24 }
  0x88   :  { %113 = vrot.lane.b32.xlu1 %v83_v35, %s228_s24  ;;  %153 = vperm.xlu0 %200, %v150_v38  }
  0x8c   :  { %147 = vperm.xlu1 %201, %v144_v39  }
  0xf2   :  { %v87_v46 = vpop.permute.xlu1 %86  ;;  %v85_v47 = vpop.permute.xlu0 %84 }
  0xf3   :  { %v89_v52 = vsel %vm88_vm2, %v85_v47, %v87_v46  ;;  %v90_v53 = vsel %vm88_vm2, %v87_v46, %v85_v47 }
  0xf4   :  { %v109_v55 = vmul.f32 %v104_v48, %v90_v53  ;;  %v110_v56 = vmul.f32 %v108_v49, %v89_v52 }
  0xf6   :  { %v112_v59 = vpop.permute.xlu0 %111  ;;  %v141_v3 = vadd.f32 %v139_v61, %v110_v56  ;;  %v140_v4 = vadd.f32 %v138_v62, %v109_v55 }
  0xff   :  { %v167_v54 = vpop.permute.xlu1 %166 }
 0x103   :  { %v114_v60 = vpop.permute.xlu1 %113  ;;  %v154_v5 = vpop.permute.xlu0 %153 }
 0x104   :  { %v116_v63 = vsel %vm115_vm3, %v112_v59, %v114_v60  ;;  %v117_v0 = vsel %vm115_vm3, %v114_v60, %v112_v59 }
 0x105   :  { %v136_v1 = vmul.f32 %v131_v57, %v116_v63  ;;  %v137_v2 = vmul.f32 %v135_v58, %v117_v0 }
 0x107   :  { %v143_v6 = vadd.f32 %v141_v3, %v137_v2  ;;  %v142_v7 = vadd.f32 %v140_v4, %v136_v1  ;;  %v148_v12 = vpop.permute.xlu1 %147 }
 0x109   :  { %v170_v8 = vmul.f32 %v167_v54, %v143_v6  ;;  %v156_v9 = vmul.f32 %v154_v5, %v142_v7  ;;  %v157_v10 = vmul.f32 %v154_v5, %v143_v6  ;;  %v169_v11 = vmul.f32 %v167_v54, %v142_v7 }
 0x10b   :  { %v172_v13 = vadd.f32 %v170_v8, %v148_v12  ;;  %v158_v14 = vadd.f32 %v156_v9, %v148_v12  ;;  %v159_v15 = vadd.f32 %v157_v10, %v148_v12  ;;  %v171_v16 = vadd.f32 %v169_v11, %v148_v12 }
 0x10d   :  { %175 = vst [vmem:[#allocation2 + $0x18] sm:$0xff] %v172_v13  ;;  %160 = vst [vmem:[#allocation2] sm:$0xff] %v158_v14 }
 0x10e   :  { %161 = vst [vmem:[#allocation2 + $0x8] sm:$0xff] %v159_v15  ;;  %174 = vst [vmem:[#allocation2 + $0x10] sm:$0xff] %v171_v16 }
 0x10f   :  { %213 = shalt.err (!%p210_p4)
}
 0x110   :  { %s230_s30 = smov 256  }
 0x111   :  { %187 = dma.vmem_to_hbm [thread:$0]  %s182_s1, 512, %s300_s4, [#allocation3], %s230_s30, %s230_s30, %s227_s2  }
 0x112   :  { %222 = dma.done.wait [#allocation3], 512  }
 0x113   :  { %223 = vsyncadd [#allocation3], 4294966784 }
 0x114   :  { %191 = vsyncpa [#allocation3], 1 }

</bundles_post_ra>
